<compile_context>
chip_gen: v5e
topology: v5e:2x2
jax: 0.10.0
libtpu: 0.0.40
codegen_flags: <defaults>
</compile_context>

<pallas_src>
import functools

import jax
import jax.numpy as jnp
import numpy as np
from jax.experimental import pallas as pl
from jax.experimental.pallas import tpu as pltpu


def _round_up(x, m):
    return ((x + m - 1) // m) * m


def signature_channels(channels, depth):
    """Same value as signatory.signature_channels(channels, depth)."""
    return sum(channels ** k for k in range(1, depth + 1))


_VMEM_LIMIT_BYTES = 48 * 1024 * 1024  # raise scoped VMEM (v5e default is 16 MiB)


# ----------------------------------------------------------------------------
# Kernel A: whole reduction dimension resident in VMEM (shallow signatures).
#   x_ref: (TB, S)   w_ref: (S, O)   b_ref: (1, O)   o_ref: (TB, O)
# ----------------------------------------------------------------------------
def _linear_kernel(x_ref, w_ref, b_ref, o_ref):
    o_ref[...] = (
        jnp.dot(x_ref[...], w_ref[...], preferred_element_type=jnp.float32)
        + b_ref[...]
    ).astype(o_ref.dtype)


# ----------------------------------------------------------------------------
# Kernel B: K-tiled accumulator (deep signatures: the full weight / activation
# row does not fit in VMEM).  grid = (batch blocks, K blocks); the K axis is a
# reduction ("arbitrary").  acc_ref is a (TB, O) f32 scratch initialised with
# the bias at k == 0.  k_rem (static) = S % TK; when nonzero, the trailing K
# block is partial and its out-of-range columns/rows (unspecified VMEM
# contents) are masked to zero before the matmul.
# ----------------------------------------------------------------------------
def _linear_kernel_ktiled(x_ref, w_ref, b_ref, o_ref, acc_ref, *, k_rem):
    k = pl.program_id(1)
    nk = pl.num_programs(1)

    @pl.when(k == 0)
    def _():
        acc_ref[...] = (jnp.zeros(acc_ref.shape, jnp.float32)
                        + b_ref[...].astype(jnp.float32))

    x = x_ref[...]
    w = w_ref[...]
    if k_rem:  # static Python check: only emitted when S % TK != 0
        tk = x.shape[1]
        valid = jnp.where(k == nk - 1, k_rem, tk)
        col = jax.lax.broadcasted_iota(jnp.int32, x.shape, 1)
        row = jax.lax.broadcasted_iota(jnp.int32, w.shape, 0)
        x = jnp.where(col < valid, x, jnp.zeros_like(x))
        w = jnp.where(row < valid, w, jnp.zeros_like(w))

    acc_ref[...] += jnp.dot(x, w, preferred_element_type=jnp.float32)

    @pl.when(k == nk - 1)
    def _():
        o_ref[...] = acc_ref[...].astype(o_ref.dtype)


# ----------------------------------------------------------------------------
# Jitted wrapper
# ----------------------------------------------------------------------------
@functools.partial(jax.jit,
                   static_argnames=("batch_block", "k_block", "max_resident_k"))
def _sig_q_forward_impl(signature, w_t, b_row, *, batch_block=512,
                        k_block=2048, max_resident_k=4096):
    """signature: (B, S) -> (B, O) float32 = signature @ W^T + b."""
    B, S = signature.shape
    S_w, O = w_t.shape
    if S != S_w:
        raise ValueError(f"signature has {S} channels, weight expects {S_w}")

    # Match activation dtype to the (possibly bf16) stored weights so the MXU
    # sees a homogeneous-dtype matmul; accumulation stays f32.
    if signature.dtype != w_t.dtype:
        signature = signature.astype(w_t.dtype)

    # Only the batch is ever padded, and only to the next multiple of 8
    # sublanes (no full zero-padded activation copy, no rounding to the tile).
    B_pad = _round_up(max(B, 8), 8)
    x = signature if B_pad == B else jnp.pad(signature, ((0, B_pad - B), (0, 0)))

    # Batch tile: multiple of 8, never larger than B_pad, capped by
    # batch_block, and chosen so the grid has >= 2 steps whenever possible so
    # ("parallel",) shards the batch across v7x's two TensorCores.
    tb = min(batch_block, max(8, _round_up(pl.cdiv(B_pad, 2), 8)))
    nb = pl.cdiv(B_pad, tb)

    if S <= max_resident_k:
        # Shallow signature: whole K resident, one MXU matmul per batch block,
        # bias added in the same pass.  Partial tail batch blocks only pollute
        # rows that are never written back / are sliced away below.
        out = pl.pallas_call(
            _linear_kernel,
            out_shape=jax.ShapeDtypeStruct((B_pad, O), jnp.float32),
            grid=(nb,),
            in_specs=[
                pl.BlockSpec((tb, S), lambda i: (i, 0)),   # batch block of x
                pl.BlockSpec((S, O), lambda i: (0, 0)),    # full weight (fetched once)
                pl.BlockSpec((1, O), lambda i: (0, 0)),    # bias row
            ],
            out_specs=pl.BlockSpec((tb, O), lambda i: (i, 0)),
            compiler_params=pltpu.CompilerParams(
                dimension_semantics=("parallel",),
                vmem_limit_bytes=_VMEM_LIMIT_BYTES),
        )(x, w_t, b_row)
    else:
        # Deep signature: stream lane-aligned K slices through VMEM and
        # accumulate in a per-batch-block f32 scratch.
        tk = min(_round_up(k_block, 128), _round_up(S, 128))
        nk = pl.cdiv(S, tk)
        kernel = functools.partial(_linear_kernel_ktiled, k_rem=S % tk)
        out = pl.pallas_call(
            kernel,
            out_shape=jax.ShapeDtypeStruct((B_pad, O), jnp.float32),
            grid=(nb, nk),
            in_specs=[
                pl.BlockSpec((tb, tk), lambda i, k: (i, k)),
                pl.BlockSpec((tk, O), lambda i, k: (k, 0)),
                pl.BlockSpec((1, O), lambda i, k: (0, 0)),
            ],
            out_specs=pl.BlockSpec((tb, O), lambda i, k: (i, 0)),
            scratch_shapes=[pltpu.VMEM((tb, O), jnp.float32)],
            compiler_params=pltpu.CompilerParams(
                dimension_semantics=("parallel", "arbitrary"),
                vmem_limit_bytes=_VMEM_LIMIT_BYTES),
        )(x, w_t, b_row)

    return out if B_pad == B else out[:B]


def sig_q_forward(signature, params, **tiling_kwargs):
    """Pallas forward of SigQFunction: (B, sig_channels) -> (B, out_dimension)."""
    return _sig_q_forward_impl(signature, params["w_t"], params["b_row"],
                               **tiling_kwargs)


# ----------------------------------------------------------------------------
# Parameter init mimicking the PyTorch module:
#   nn.init.xavier_uniform_(linear.weight); linear.bias.data.fill_(initial_bias)
# The weight is pre-transposed ONCE into the kernel layout (S, O); pass
# weight_dtype=jnp.bfloat16 in production to halve HBM traffic of the dominant
# operand (loosens the achievable tolerance to ~1e-2).
# ----------------------------------------------------------------------------
def init_params(key, in_channels, out_dim, sig_depth, initial_bias=0.1,
                weight_dtype=jnp.float32):
    S = signature_channels(in_channels, sig_depth)
    bound = float(np.sqrt(6.0 / (S + out_dim)))              # xavier_uniform
    w = jax.random.uniform(key, (out_dim, S), jnp.float32, -bound, bound)
    b = jnp.full((out_dim,), float(initial_bias), jnp.float32)
    return {
        "w": w, "b": b,                               # PyTorch layout (reference)
        "w_t": jnp.asarray(w.T, dtype=weight_dtype),  # kernel layout (S, O)
        "b_row": b.reshape(1, out_dim),               # kernel layout (1, O)
        "out_dim": out_dim, "sig_channels": S,
    }


def sig_q_reference(signature, params):
    """Pure-JAX reference of the PyTorch forward for verification."""
    return signature @ params["w"].T + params["b"]


if __name__ == "__main__":
    key = jax.random.PRNGKey(0)
    k_p1, k_x1, k_p2, k_x2 = jax.random.split(key, 4)

    # --- 1. Small config (resident-K path): channels=4, depth=3 -> S = 84 ---
    IN_CHANNELS, SIG_DEPTH, OUT_DIM, BATCH = 4, 3, 4, 2
    params = init_params(k_p1, IN_CHANNELS, OUT_DIM, SIG_DEPTH)
    sig = jax.random.normal(k_x1, (BATCH, params["sig_channels"]), jnp.float32)

    out = jax.block_until_ready(sig_q_forward(sig, params))
    assert out.shape == (BATCH, OUT_DIM)
    ref = sig_q_reference(sig, params)
    np.testing.assert_allclose(np.asarray(out), np.asarray(ref),
                               rtol=1e-5, atol=1e-5)

    # --- 2. Deeper signature, forced K-tiled accumulator path ---------------
    #        channels=4, depth=5 -> S = 4+16+64+256+1024 = 1364; B=18
    #        exercises batch padding, a partial tail batch tile, K-block
    #        accumulation and masking of the partial trailing K block.
    IN2, DEPTH2, OUT2, B2 = 4, 5, 4, 18
    params2 = init_params(k_p2, IN2, OUT2, DEPTH2)
    sig2 = jax.random.normal(k_x2, (B2, params2["sig_channels"]), jnp.float32)
    out2 = jax.block_until_ready(
        sig_q_forward(sig2, params2, max_resident_k=512, k_block=512))
    assert out2.shape == (B2, OUT2)
    ref2 = (np.asarray(sig2, np.float64) @ np.asarray(params2["w"], np.float64).T
            + np.asarray(params2["b"], np.float64))
    np.testing.assert_allclose(np.asarray(out2, np.float64), ref2,
                               rtol=1e-3, atol=1e-3)

    print("KERNEL_OK")
</pallas_src>

<mosaic_0001>
module attributes {stable_mosaic.version = 11 : i64} {
  func.func @_linear_kernel(%arg0: i32, %arg1: memref<8x84xf32, #tpu.memory_space<vmem>>, %arg2: memref<84x4xf32, #tpu.memory_space<vmem>>, %arg3: memref<1x4xf32, #tpu.memory_space<vmem>>, %arg4: memref<8x4xf32, #tpu.memory_space<vmem>>) attributes {dimension_semantics = [#tpu.dimension_semantics<parallel>], iteration_bounds = array<i64: 1>, scalar_prefetch = 0 : i64, scratch_operands = 0 : i64, tpu.core_type = #tpu.core_type<tc>, window_params = [{transform_indices = @transform_0, window_bounds = array<i64: 8, 84>}, {pipeline_mode = #tpu.pipeline_mode<synchronous>, transform_indices = @transform_1, window_bounds = array<i64: 84, 4>}, {pipeline_mode = #tpu.pipeline_mode<synchronous>, transform_indices = @transform_2, window_bounds = array<i64: 1, 4>}, {transform_indices = @transform_3, window_bounds = array<i64: 8, 4>}]} {
    %c0 = arith.constant 0 : index
    %c0_0 = arith.constant 0 : index
    %0 = vector.load %arg1[%c0, %c0_0] : memref<8x84xf32, #tpu.memory_space<vmem>>, vector<8x84xf32>
    %c0_1 = arith.constant 0 : index
    %c0_2 = arith.constant 0 : index
    %1 = vector.load %arg2[%c0_1, %c0_2] : memref<84x4xf32, #tpu.memory_space<vmem>>, vector<84x4xf32>
    %cst = arith.constant dense<0.000000e+00> : vector<8x4xf32>
    %2 = tpu.matmul %0, %1, %cst {dimension_numbers = #tpu.dot_dimension_numbers<[1], [0], [0], [1], [0, 0, 1, 1], [], []>} : vector<8x84xf32>, vector<84x4xf32>, vector<8x4xf32> -> vector<8x4xf32>
    %c0_3 = arith.constant 0 : index
    %c0_4 = arith.constant 0 : index
    %3 = vector.load %arg3[%c0_3, %c0_4] : memref<1x4xf32, #tpu.memory_space<vmem>>, vector<1x4xf32>
    %4 = vector.broadcast %3 : vector<1x4xf32> to vector<8x4xf32>
    %5 = arith.addf %2, %4 : vector<8x4xf32>
    %c0_5 = arith.constant 0 : index
    %c0_6 = arith.constant 0 : index
    %6 = vector.load %arg4[%c0_5, %c0_6] : memref<8x4xf32, #tpu.memory_space<vmem>>, vector<8x4xf32>
    tpu.vector_store %arg4[%c0_5, %c0_6], %5 {strides = array<i32>} : memref<8x4xf32, #tpu.memory_space<vmem>>, vector<8x4xf32>,
    return
  }
  func.func @transform_0(%arg0: i32) -> (i32, i32) {
    %c0_i32 = arith.constant 0 : i32
    %c0_i32_0 = arith.constant 0 : i32
    return %arg0, %c0_i32 : i32, i32
  }
  func.func @transform_1(%arg0: i32) -> (i32, i32) {
    %c0_i32 = arith.constant 0 : i32
    %c0_i32_0 = arith.constant 0 : i32
    %c0_i32_1 = arith.constant 0 : i32
    return %c0_i32, %c0_i32_0 : i32, i32
  }
  func.func @transform_2(%arg0: i32) -> (i32, i32) {
    %c0_i32 = arith.constant 0 : i32
    %c0_i32_0 = arith.constant 0 : i32
    %c0_i32_1 = arith.constant 0 : i32
    return %c0_i32, %c0_i32_0 : i32, i32
  }
  func.func @transform_3(%arg0: i32) -> (i32, i32) {
    %c0_i32 = arith.constant 0 : i32
    %c0_i32_0 = arith.constant 0 : i32
    return %arg0, %c0_i32 : i32, i32
  }
}

</mosaic_0001>

<bundles_post_ra>
// kernel: _sig_q_forward_impl.1
= control target key start
LH: loop header
LB: loop body
LE: loop exit
PB: predicated region body
PF: predicated region fallthrough
CT: control target
= control target key end

     0   :  { %vm34_vm0 = vcmask 1043456   ;;  %vm30_vm1 = vcmask 687104   ;;  %vm58_vm2 = vcmask 31744   ;;  %s129_s1 = inlined_call_operand.vmem [shape: f32[84,4], index: 1, kind: input, shape index: {}]   ;;  %s130_s2 = inlined_call_operand.vmem [shape: f32[1,4], index: 2, kind: input, shape index: {}]   ;;  %s131_s0 = inlined_call_operand.vmem [shape: f32[8,84], index: 0, kind: input, shape index: {}]   ;;  %s132_s3 = inlined_call_operand.vmem [shape: f32[8,4], index: 3, kind: output, shape index: {}]  }
   0x1   :  { %v25_v0 = vld [vmem:[%s129_s1 + $0x50] sm:$0xf]  ;;  %v24_v1 = vld [vmem:[%s129_s1 + $0x48] sm:$0xff]  ;;  %v23_v2 = vld [vmem:[%s129_s1 + $0x40] sm:$0xff] }
   0x2   :  { %64 = vmatpush.msk.msra.mxu0 %vm34_vm0, %v25_v0  ;;  %v22_v3 = vld [vmem:[%s129_s1 + $0x38] sm:$0xff]  ;;  %v21_v4 = vld [vmem:[%s129_s1 + $0x30] sm:$0xff]  ;;  %v20_v5 = vld [vmem:[%s129_s1 + $0x28] sm:$0xff] }
   0x3   :  { %v19_v6 = vld [vmem:[%s129_s1 + $0x20] sm:$0xff]  ;;  %v18_v7 = vld [vmem:[%s129_s1 + $0x18] sm:$0xff]  ;;  %v17_v8 = vld [vmem:[%s129_s1 + $0x10] sm:$0xff] }
   0x4   :  { %44 = vmatpush.msra.mxu0 %v24_v1  ;;  %v16_v9 = vld [vmem:[%s129_s1 + $0x8] sm:$0xff]  ;;  %v15_v10 = vld [vmem:[%s129_s1] sm:$0xff] }
   0x5   :  { %v14_v11 = vld [vmem:[%s131_s0] sm:$0xff] }
   0x6   :  { %45 = vmatpush.msra.mxu0 %v23_v2  ;;  %v66_v12 = vld [vmem:[%s130_s2] ss:$0 sm:$0xff] }
   0x8   :  { %46 = vmatpush.msra.mxu0 %v22_v3 }
   0xa   :  { %47 = vmatpush.msra.mxu0 %v21_v4 }
   0xc   :  { %48 = vmatpush.msra.mxu0 %v20_v5 }
   0xe   :  { %49 = vmatpush.msra.mxu0 %v19_v6 }
  0x10   :  { %50 = vmatpush.msra.mxu0 %v18_v7 }
  0x12   :  { %51 = vmatpush.msra.mxu0 %v17_v8 }
  0x14   :  { %52 = vmatpush.msra.mxu0 %v16_v9 }
  0x16   :  { %53 = vmatpush.msra.mxu0 %v15_v10 }
  0x17   :  { %65 = vmatmul.msk.f32.vlgmr.msra.gmra.mxu0 %vm30_vm1, %v14_v11 }
  0x94   :  { %v55_v13 = vpop.f32.mrf.mxu0 }
  0x95   :  { %v56_v14 = vadd.f32 %v66_v12, %v55_v13 }
  0x97   :  { %59 = vst.msk [vmem:[%s132_s3] sm:$0xff] %vm58_vm2, %v56_v14 }

</bundles_post_ra>
